<compile_context>
chip_gen: v6e
topology: v6e:2x2x1
jax: 0.10.0
libtpu: 0.0.40
codegen_flags: <defaults>
</compile_context>

<pallas_src>
import jax
import jax.numpy as jnp
from jax.experimental import pallas as pl
from jax.experimental.pallas import tpu as pltpu

_VMEM_TILE_BUDGET_BYTES = 40 * 1024 * 1024   # working-set budget used to size tiles
_VMEM_LIMIT_BYTES = 48 * 1024 * 1024         # scoped VMEM limit (safe on v5e/v6e/v7x)
_MAX_TILE_ROWS = 1024


def _layernorm_kernel(x_ref, g_ref, b_ref, o_ref):
    # x_ref: (tile_rows, D)   g_ref, b_ref: (1, D)   o_ref: (tile_rows, D)
    x = x_ref[...].astype(jnp.float32)
    d = x.shape[-1]

    mean = jnp.mean(x, axis=-1, keepdims=True)
    diff = x - mean
    # torch.var default: unbiased estimator (divide by D - 1)
    var = jnp.sum(diff * diff, axis=-1, keepdims=True) / jnp.float32(d - 1)

    inv_std = jax.lax.rsqrt(var + jnp.float32(1e-12))
    g = g_ref[...].astype(jnp.float32)
    b = b_ref[...].astype(jnp.float32)

    y = diff * (g * inv_std) + b
    o_ref[...] = y.astype(o_ref.dtype)


def _pick_tile_rows(n_rows: int, d_model: int, itemsize: int) -> int:
    """Pick a large, VMEM-safe, sublane-aligned row tile."""
    # Packed sublane tile: 8 rows for 4-byte dtypes, 16 for bf16, 32 for int8/fp8.
    pack = max(8, 32 // max(itemsize, 1))

    # Per-row VMEM cost estimate:
    #   input + output double-buffered in the input dtype (4x tile)  +
    #   ~3 f32 intermediates (x, diff, y) the compiler may materialize.
    per_row_bytes = d_model * (4 * itemsize + 3 * 4)
    tile = _VMEM_TILE_BUDGET_BYTES // max(per_row_bytes, 1)
    tile = min(tile, _MAX_TILE_ROWS, max(n_rows, pack))
    tile = max(pack, (tile // pack) * pack)

    # Keep >= 2 grid steps when possible so both v7x TensorCores get work.
    if pl.cdiv(n_rows, tile) < 2 and n_rows > pack:
        half = -(-n_rows // 2)                     # ceil(n_rows / 2)
        tile = max(pack, -(-half // pack) * pack)  # round half up to pack
    return tile


def layer_norm(x: jax.Array, g: jax.Array, b: jax.Array) -> jax.Array:
    """LayerNorm over the last axis of x (any leading dims); params g, b of shape [d_model]."""
    orig_shape = x.shape
    d_model = orig_shape[-1]
    x2 = x.reshape(-1, d_model)
    n_rows = x2.shape[0]

    g2 = g.reshape(1, d_model)
    b2 = b.reshape(1, d_model)

    tile_rows = _pick_tile_rows(n_rows, d_model, jnp.dtype(x.dtype).itemsize)
    grid = (pl.cdiv(n_rows, tile_rows),)

    # TODO(synk): if d_model is not a multiple of 128, output stores are masked
    # (vst.msk); a lane-dense repack in the wrapper could recover store bandwidth.

    out = pl.pallas_call(
        _layernorm_kernel,
        out_shape=jax.ShapeDtypeStruct((n_rows, d_model), x.dtype),
        grid_spec=pltpu.PrefetchScalarGridSpec(
            num_scalar_prefetch=0,
            grid=grid,
            in_specs=[
                pl.BlockSpec((tile_rows, d_model), lambda i: (i, 0)),
                pl.BlockSpec((1, d_model), lambda i: (0, 0)),
                pl.BlockSpec((1, d_model), lambda i: (0, 0)),
            ],
            out_specs=pl.BlockSpec((tile_rows, d_model), lambda i: (i, 0)),
        ),
        compiler_params=pltpu.CompilerParams(
            dimension_semantics=("parallel",),
            vmem_limit_bytes=_VMEM_LIMIT_BYTES,
        ),
    )(x2, g2, b2)

    return out.reshape(orig_shape)


if __name__ == "__main__":
    key = jax.random.PRNGKey(0)
    batch, seq, d_model = 2, 8, 32

    x = jax.random.normal(key, (batch, seq, d_model), dtype=jnp.float32)

    # Deterministic parameter init matching nn.Parameter(torch.ones/zeros(d_model))
    g = jnp.ones((d_model,), dtype=jnp.float32)
    b = jnp.zeros((d_model,), dtype=jnp.float32)

    y = layer_norm(x, g, b)
    jax.block_until_ready(y)

    # Reference check (pure JAX, unbiased variance like torch.var default)
    mean = jnp.mean(x, axis=-1, keepdims=True)
    var = jnp.sum((x - mean) ** 2, axis=-1, keepdims=True) / (d_model - 1)
    y_ref = (x - mean) * g / jnp.sqrt(var + 1e-12) + b
    assert jnp.allclose(y, y_ref, atol=1e-5, rtol=1e-5), "mismatch vs reference"

    print("KERNEL_OK")
</pallas_src>

<mosaic_0001>
module attributes {stable_mosaic.version = 11 : i64} {
  func.func @_layernorm_kernel(%arg0: i32, %arg1: memref<8x32xf32, #tpu.memory_space<vmem>>, %arg2: memref<1x32xf32, #tpu.memory_space<vmem>>, %arg3: memref<1x32xf32, #tpu.memory_space<vmem>>, %arg4: memref<8x32xf32, #tpu.memory_space<vmem>>) attributes {dimension_semantics = [#tpu.dimension_semantics<parallel>], iteration_bounds = array<i64: 2>, scalar_prefetch = 0 : i64, scratch_operands = 0 : i64, tpu.core_type = #tpu.core_type<tc>, window_params = [{transform_indices = @transform_0, window_bounds = array<i64: 8, 32>}, {pipeline_mode = #tpu.pipeline_mode<synchronous>, transform_indices = @transform_1, window_bounds = array<i64: 1, 32>}, {pipeline_mode = #tpu.pipeline_mode<synchronous>, transform_indices = @transform_2, window_bounds = array<i64: 1, 32>}, {transform_indices = @transform_3, window_bounds = array<i64: 8, 32>}]} {
    %c0 = arith.constant 0 : index
    %c0_0 = arith.constant 0 : index
    %0 = vector.load %arg1[%c0, %c0_0] : memref<8x32xf32, #tpu.memory_space<vmem>>, vector<8x32xf32>
    %cst = arith.constant dense<0.000000e+00> : vector<8xf32>
    %1 = vector.multi_reduction <add>, %0, %cst [1] : vector<8x32xf32> to vector<8xf32>
    %2 = vector.shape_cast %1 : vector<8xf32> to vector<8x1xf32>
    %cst_1 = arith.constant 3.200000e+01 : f32
    %3 = vector.broadcast %cst_1 : f32 to vector<8x1xf32>
    %4 = arith.divf %2, %3 : vector<8x1xf32>
    %5 = vector.broadcast %4 : vector<8x1xf32> to vector<8x32xf32>
    %6 = arith.subf %0, %5 : vector<8x32xf32>
    %7 = arith.mulf %6, %6 : vector<8x32xf32>
    %cst_2 = arith.constant dense<0.000000e+00> : vector<8xf32>
    %8 = vector.multi_reduction <add>, %7, %cst_2 [1] : vector<8x32xf32> to vector<8xf32>
    %9 = vector.shape_cast %8 : vector<8xf32> to vector<8x1xf32>
    %cst_3 = arith.constant 3.100000e+01 : f32
    %10 = vector.broadcast %cst_3 : f32 to vector<8x1xf32>
    %11 = arith.divf %9, %10 : vector<8x1xf32>
    %cst_4 = arith.constant 9.99999996E-13 : f32
    %12 = vector.broadcast %cst_4 : f32 to vector<8x1xf32>
    %13 = arith.addf %11, %12 : vector<8x1xf32>
    %14 = math.rsqrt %13 : vector<8x1xf32>
    %c0_5 = arith.constant 0 : index
    %c0_6 = arith.constant 0 : index
    %15 = vector.load %arg2[%c0_5, %c0_6] : memref<1x32xf32, #tpu.memory_space<vmem>>, vector<1x32xf32>
    %c0_7 = arith.constant 0 : index
    %c0_8 = arith.constant 0 : index
    %16 = vector.load %arg3[%c0_7, %c0_8] : memref<1x32xf32, #tpu.memory_space<vmem>>, vector<1x32xf32>
    %17 = vector.broadcast %15 : vector<1x32xf32> to vector<8x32xf32>
    %18 = vector.broadcast %14 : vector<8x1xf32> to vector<8x32xf32>
    %19 = arith.mulf %17, %18 : vector<8x32xf32>
    %20 = arith.mulf %6, %19 : vector<8x32xf32>
    %21 = vector.broadcast %16 : vector<1x32xf32> to vector<8x32xf32>
    %22 = arith.addf %20, %21 : vector<8x32xf32>
    %c0_9 = arith.constant 0 : index
    %c0_10 = arith.constant 0 : index
    %23 = vector.load %arg4[%c0_9, %c0_10] : memref<8x32xf32, #tpu.memory_space<vmem>>, vector<8x32xf32>
    tpu.vector_store %arg4[%c0_9, %c0_10], %22 {strides = array<i32>} : memref<8x32xf32, #tpu.memory_space<vmem>>, vector<8x32xf32>,
    return
  }
  func.func @transform_0(%arg0: i32) -> (i32, i32) {
    %c0_i32 = arith.constant 0 : i32
    %c0_i32_0 = arith.constant 0 : i32
    return %arg0, %c0_i32 : i32, i32
  }
  func.func @transform_1(%arg0: i32) -> (i32, i32) {
    %c0_i32 = arith.constant 0 : i32
    %c0_i32_0 = arith.constant 0 : i32
    %c0_i32_1 = arith.constant 0 : i32
    return %c0_i32, %c0_i32_0 : i32, i32
  }
  func.func @transform_2(%arg0: i32) -> (i32, i32) {
    %c0_i32 = arith.constant 0 : i32
    %c0_i32_0 = arith.constant 0 : i32
    %c0_i32_1 = arith.constant 0 : i32
    return %c0_i32, %c0_i32_0 : i32, i32
  }
  func.func @transform_3(%arg0: i32) -> (i32, i32) {
    %c0_i32 = arith.constant 0 : i32
    %c0_i32_0 = arith.constant 0 : i32
    return %arg0, %c0_i32 : i32, i32
  }
}

</mosaic_0001>

<bundles_post_ra>
// kernel: tpu_custom_call.1
= control target key start
LH: loop header
LB: loop body
LE: loop exit
PB: predicated region body
PF: predicated region fallthrough
CT: control target
= control target key end

     0   :  { %8 = vsyncpa [#allocation3], 0  ;;  %s632_s0 = inlined_call_operand.hbm [shape: f32[16,32], index: 0, kind: input, shape index: {}]   ;;  %s633_s1 = inlined_call_operand.vmem [shape: f32[1,32], index: 1, kind: input, shape index: {}]   ;;  %s634_s2 = inlined_call_operand.vmem [shape: f32[1,32], index: 2, kind: input, shape index: {}]   ;;  %s635_s3 = inlined_call_operand.hbm [shape: f32[16,32], index: 3, kind: output, shape index: {}]  }
   0x1   :  { %10 = vsyncpa [#allocation3 + $0x1], 0 }
   0x2   :  { %11 = vsyncpa [#allocation4], 0 }
   0x3   :  { %13 = vsyncpa [#allocation4 + $0x1], 0  ;;  %s482_s12 = smov 0   ;;  %s484_s13 = smov 0  }
   0x4   :  { %s486_s14 = smov 0   ;;  %s488_s15 = smov 0  }
   0x5 LB: > { %s503_s16 = sadd.s32 4294967295, %s458_s15   ;;  %s304_s17 = sadd.s32 4294967294, %s458_s15   ;;  %s458_s15 = sphi %s488_s15, %s652_s15   ;;  %s454_s14 = sphi %s486_s14, %s651_s14   ;;  %s450_s13 = sphi %s484_s13, %s650_s13   ;;  %s446_s12 = sphi %s482_s12, %s649_s12  }
   0x6   : > { %s507_s18 = sadd.s32 1, %s458_s15   ;;  %s26_s19 = sadd.s32 1, %s454_s14 }
   0x7   : > { %s23_s20 = ssub.s32 %s458_s15, %s507_s18  ;;  %p33_p0 = scmp.ne.s32.totalorder %s454_s14, %s450_s13 }
   0x8   : > { %p24_p1 = scmp.eq.s32.totalorder %s23_s20, 0  ;;  %p34_p2 = scmp.eq.s32.totalorder %s458_s15, 0 }
   0x9   : > { %p39_p3 = scmp.ne.s32.totalorder %s450_s13, %s446_s12  ;;  %p40_p4 = scmp.eq.s32.totalorder %s503_s16, 0 }
   0xa   : > { %s519_s21 = scalar_select %p24_p1, %s454_s14, %s26_s19  }
   0xb   : > { %p521_p5 = por %p34_p2, %p33_p0  ;;  %p525_p6 = por %p40_p4, %p39_p3 }
   0xc   : > { %p105_p7 = scmp.eq.s32.totalorder %s503_s16, 1  ;;  %p111_p8 = scmp.eq.s32.totalorder %s304_s17, 1 }
   0xd   : > { %s639_s23 = scalar_select %p525_p6, 1, 0 }
   0xe   : > { %p330_p10 = scmp.lt.s32.totalorder %s458_s15, 2  ;;  %p532_p11 = por %p105_p7, %p33_p0 }
   0xf   : > { %p536_p12 = por %p111_p8, %p39_p3  ;;  %s137_s26 = sand.u32 1, %s454_s14  }
  0x10   : > { %s640_s24 = scalar_select %p532_p11, 1, 0 }
  0x11   : > { %s641_s25 = scalar_select %p536_p12, 1, 0 }
  0x12   : > { %s308_s27 = sshll.u32 %s458_s15, 7  ;;  %s307_s28 = sshll.u32 %s137_s26, 3 }
  0x13   : > { %s545_s4 = scalar_lea.hbm %s632_s0, %s308_s27  ;;  %s141_s5 = scalar_lea.vmem [#allocation2], %s307_s28 }
  0x14   : > { %s148_s6 = sshll.u32 %s141_s5, 4  ;;  %p549_p13 = pnand %p330_p10, %p521_p5  ;;  %s553_s6 = int_to_ptr.vmem [resolvable:$true] %s148_s6 }
  0x15   : > { %s138_s8 = scalar_lea.sflag [#allocation3], %s137_s26  ;;  %s366_s9 = scalar_lea.hbm %s545_s4, 128 }
  0x16   : > { %p367_p2 = scmp.ne.s32.totalorder %s545_s4, %s366_s9  ;;  %p368_p3 = pneg %p549_p13 }
  0x17   : > { %s371_s17 = scalar_lea.hbm %s632_s0, 256  ;;  %p372_p5 = scmp.lt.s32.totalorder %s545_s4, %s632_s0 }
  0x18   : > { %p369_p4 = pnand %p368_p3, %p367_p2  ;;  %p373_p8 = scmp.lt.s32.totalorder %s371_s17, %s366_s9 }
  0x1a   : > { %p370_p7 = pneg %p369_p4  ;;  %p374_p10 = por %p373_p8, %p372_p5 }
  0x1c   : > { %p375_p9 = pnand %p374_p10, %p370_p7 }
  0x1e   : > { %378 = shalt.err (!%p375_p9)
}
  0x1f   : > { %s379_s22 = scalar_lea.vmem %s553_s6, 128  ;;  %s460_s26 = smov [#allocation2]  }
  0x20   : > { %p380_p0 = scmp.ne.s32.totalorder %s553_s6, %s379_s22  ;;  %s384_s27 = sshll.u32 %s460_s26, 4  ;;  %s385_s27 = int_to_ptr.vmem [resolvable:$false] %s384_s27 }
  0x21   : > { %s386_s28 = scalar_lea.vmem %s385_s27, 256  ;;  %p387_p4 = scmp.lt.s32.totalorder %s553_s6, %s385_s27 }
  0x22   : > { %p382_p1 = pnand %p380_p0, %p368_p3  ;;  %p388_p12 = scmp.lt.s32.totalorder %s386_s28, %s379_s22 }
  0x24   : > { %p383_p2 = pneg %p382_p1  ;;  %p389_p11 = por %p388_p12, %p387_p4 }
  0x26   : > { %p390_p6 = pnand %p389_p11, %p383_p2 }
  0x28   : > { %393 = shalt.err (!%p390_p6)
}
  0x29   : > { %325 = dma.hbm_to_vmem [thread:$0]  (!%p549_p13), %s545_s4, 128, %s553_s6, %s138_s8  }
  0x2a   : > { %p643_p9 = scmp.lt.s32.totalorder %s458_s15, 3  ;;  %p644_p7 = scmp.ge.s32.totalorder %s458_s15, 1 }
  0x2c   : > { %p154_p0 = pnand %p644_p7, %p643_p9 }
  0x2d   : > { %s580_s29 = sand.u32 (!%p154_p0), 1, %s450_s13   ;;  %p645_p6 = scmp.ne.s32.totalorder (!%p154_p0), %s639_s23, 0 }
  0x2e   : > { %157 = sbr.rel (%p154_p0) target bundleno = 374 (0x176), region = 32  ;;  %s310_s30 = sshll.u32 (!%p154_p0), %s580_s29, 3 }
  0x2f   : > { %s160_s5 = scalar_lea.sflag (!%p154_p0), [#allocation3], %s580_s29  ;;  %s163_s9 = scalar_lea.vmem (!%p154_p0), [#allocation2], %s310_s30 }
  0x33   : > { %437 = dma.done.wait (%p645_p6), %s160_s5, 128  }
  0x34   : > { %439 = vsyncadd (%p645_p6), %s160_s5, 4294967168  ;;  %vm187_vm0 = vcmask 261120   ;;  %v186_v0 = vld [vmem:[%s163_s9] sm:$0xff]  ;;  %s315_s8 = sshll.u32 %s503_s16, 7  ;;  %s185_s10 = scalar_lea.vmem [#allocation5], %s310_s30 }
  0x35   : > { %v188_v1 = vsel %vm187_vm0, %v186_v0, 0.0  ;;  %v312_v10 = vld [vmem:[%s633_s1] ss:$0 sm:$0xff]  ;;  %s234_s11 = sshll.u32 %s185_s10, 4  ;;  %s232_s20 = scalar_lea.hbm %s635_s3, %s315_s8  ;;  %s235_s11 = int_to_ptr.vmem [resolvable:$true] %s234_s11 }
  0x36   : > { %189 = vadd.xlane.f32.xlu0 %v188_v1  ;;  %v313_v13 = vld [vmem:[%s634_s2] ss:$0 sm:$0xff]  ;;  %s221_s22 = scalar_lea.sflag [#allocation4], %s580_s29  ;;  %s394_s26 = scalar_lea.vmem %s235_s11, 128 }
  0x37   : > { %p395_p11 = scmp.ne.s32.totalorder %s235_s11, %s394_s26  ;;  %p646_p12 = scmp.ne.s32.totalorder %s640_s24, 0 }
  0x38   : > { %s461_s27 = smov [#allocation5]  }
  0x39   : > { %p396_p13 = pnand %p395_p11, %p646_p12  ;;  %s398_s28 = sshll.u32 %s461_s27, 4  ;;  %s399_s28 = int_to_ptr.vmem [resolvable:$false] %s398_s28 }
  0x3a   : > { %s400_s16 = scalar_lea.vmem %s399_s28, 256  ;;  %p401_p3 = scmp.lt.s32.totalorder %s235_s11, %s399_s28 }
  0x3b   : > { %p397_p1 = pneg %p396_p13  ;;  %p402_p5 = scmp.lt.s32.totalorder %s400_s16, %s394_s26 }
  0x3d   : > { %p403_p8 = por %p402_p5, %p401_p3 }
  0x3f   : > { %p404_p10 = pnand %p403_p8, %p397_p1 }
  0xbf   : > { %v190_v2 = vpop.xlane.xlu0 %189 }
  0xc0   : > { %v192_v3 = vmul.f32 0.03125, %v190_v2 }
  0xc2   : > { %v193_v4 = vsub.f32 %v186_v0, %v192_v3 }
  0xc4   : > { %v194_v5 = vmul.f32 %v193_v4, %v193_v4 }
  0xc6   : > { %v195_v6 = vsel %vm187_vm0, %v194_v5, 0.0 }
  0xc7   : > { %196 = vadd.xlane.f32.xlu0 %v195_v6 }
 0x150   : > { %v197_v7 = vpop.xlane.xlu0 %196 }
 0x151   : > { %v199_v8 = vmul.f32 0.032258064, %v197_v7 }
 0x153   : > { %v200_v9 = vadd.f32 1e-12, %v199_v8 }
 0x155   : > { %364 = vrsqrt.f32 %v200_v9 }
 0x162   : > { %v365_v11 = vpop.eup %364 }
 0x163   : > { %v210_v12 = vmul.f32 %v365_v11, %v312_v10 }
 0x165   : > { %v211_v14 = vmul.f32 %v210_v12, %v193_v4 }
 0x167   : > { %v218_v15 = vadd.f32 %v313_v13, %v211_v14 }
 0x169   : > { %219 = vst.msk [vmem:[%s185_s10] sm:$0xff] %vm187_vm0, %v218_v15 }
 0x16a   : > { %407 = shalt.err (!%p404_p10)
}
 0x16b   : > { %s408_s30 = scalar_lea.hbm %s232_s20, 128  ;;  %s412_s9 = scalar_lea.hbm %s635_s3, 256 }
 0x16c   : > { %p409_p2 = scmp.ne.s32.totalorder %s232_s20, %s408_s30  ;;  %p413_p7 = scmp.lt.s32.totalorder %s232_s20, %s635_s3 }
 0x16d   : > { %p414_p0 = scmp.lt.s32.totalorder %s412_s9, %s408_s30 }
 0x16e   : > { %p410_p4 = pnand %p409_p2, %p646_p12 }
 0x16f   : > { %p415_p6 = por %p414_p0, %p413_p7 }
 0x170   : > { %p411_p9 = pneg %p410_p4 }
 0x172   : > { %p416_p11 = pnand %p415_p6, %p411_p9 }
 0x174   : > { %419 = shalt.err (!%p416_p11)
}
 0x175   : > { %320 = dma.vmem_to_hbm [thread:$0]  (%p646_p12), %s235_s11, 128, %s232_s20, %s221_s22  }
 0x176 PF: > { %s246_s6 = sand.u32 1, %s446_s12   ;;  %p647_p13 = scmp.ne.s32.totalorder %s641_s25, 0 }
 0x177   : > { %p648_p1 = scmp.ge.s32.totalorder %s458_s15, 2  ;;  %s247_s7 = scalar_lea.sflag [#allocation4], %s246_s6 }
 0x179   : > { %p327_p3 = pnand %p648_p1, %p647_p13 }
 0x17b   : > { %p328_p5 = pneg %p327_p3 }
 0x17d   : > { %441 = dma.done.wait (%p328_p5), %s247_s7, 128  }
 0x17e   : > { %443 = vsyncadd (%p328_p5), %s247_s7, 4294967168  ;;  %p16_p8 = scmp.ge.s32.totalorder %s507_s18, 4   ;;  %s649_s12 = smov %s450_s13 }
 0x17f   : > { %s650_s13 = smov %s454_s14  ;;  %s651_s14 = smov %s519_s21 }
 0x180   : > { %s652_s15 = smov %s507_s18  ;;  %18 = sbr.rel (!%p16_p8) target bundleno = 5 (0x5), region = 77 }
 0x185   :  { %252 = vsyncpa [#allocation3], 1 }
 0x186   :  { %254 = vsyncpa [#allocation3 + $0x1], 1 }
 0x187   :  { %255 = vsyncpa [#allocation4], 1 }
 0x188   :  { %257 = vsyncpa [#allocation4 + $0x1], 1 }

</bundles_post_ra>
